<compile_context>
chip_gen: v5e
topology: v5e:2x2
jax: 0.10.0
libtpu: 0.0.40
codegen_flags: <defaults>
</compile_context>

<pallas_src>
import jax
import jax.numpy as jnp
from jax import lax
from jax.experimental import pallas as pl
from jax.experimental.pallas import tpu as pltpu

_LANE = 128


def _svq_kernel(x_ref, emb_ref, embT_ref, q_ref):
    x = x_ref[0]                                  # (D, Tt) native dtype
    emb = emb_ref[...]                            # (K, D)  native dtype
    embT = embT_ref[...]                          # (D, K)  native dtype
    k = emb.shape[0]
    tt = x.shape[1]

    # scores[k, t] = <emb[k], x[:, t]>.  argmin(2 - 2*scores) == argmax(scores)
    # (monotone affine map), so skip forming eu_dis entirely.
    scores = jnp.dot(emb, x, preferred_element_type=jnp.float32)     # (K, Tt)

    # argmax over the code (sublane) axis with first-index tie-breaking,
    # matching torch.argmin's tie-break rule.  All elementwise work in f32.
    max_val = jnp.max(scores, axis=0, keepdims=True)                  # (1, Tt)
    iota_k = lax.broadcasted_iota(jnp.int32, (k, tt), 0)              # (K, Tt)
    is_max = scores == max_val
    idx = jnp.min(jnp.where(is_max, iota_k, k), axis=0, keepdims=True)  # (1,Tt)

    # Gather codebook rows via one-hot matmul (MXU friendly).  one_hot is
    # exact in the embedding dtype (0/1), so no precision is lost.
    one_hot = (iota_k == idx).astype(embT.dtype)                      # (K, Tt)
    quant = jnp.dot(embT, one_hot, preferred_element_type=jnp.float32)  # (D,Tt)
    q_ref[0] = quant.astype(q_ref.dtype)


def svq_forward(x, embedding, *, tile_t=256):
    """x: (B, N, T) with N == code_dim; embedding: (num_code, code_dim)."""
    B, D, T = x.shape
    K, Dk = embedding.shape
    assert D == Dk

    # Pick a lane-dense T tile: a multiple of 128, clamped to the padded T.
    t_round = pl.cdiv(T, _LANE) * _LANE
    tile_t = max(_LANE, min(int(tile_t), t_round))
    tile_t = pl.cdiv(tile_t, _LANE) * _LANE
    T_pad = pl.cdiv(T, tile_t) * tile_t

    # Pad T (zeros) instead of asserting divisibility; padded columns produce
    # harmless garbage that is sliced off below.
    x_p = x if T_pad == T else jnp.pad(x, ((0, 0), (0, 0), (0, T_pad - T)))

    # Pre-transpose the codebook once in the wrapper (tiny vs. activations)
    # so the gather-matmul needs no in-kernel transpose.
    emb_T = embedding.T                                               # (D, K)

    grid = (B, T_pad // tile_t)
    q = pl.pallas_call(
        _svq_kernel,
        out_shape=jax.ShapeDtypeStruct((B, D, T_pad), embedding.dtype),
        grid_spec=pltpu.PrefetchScalarGridSpec(
            num_scalar_prefetch=0,
            grid=grid,
            in_specs=[
                pl.BlockSpec((1, D, tile_t), lambda b, t: (b, 0, t)),
                # Constant index_map -> codebook DMA'd once, stays resident.
                pl.BlockSpec((K, D), lambda b, t: (0, 0)),
                pl.BlockSpec((D, K), lambda b, t: (0, 0)),
            ],
            out_specs=pl.BlockSpec((1, D, tile_t), lambda b, t: (b, 0, t)),
        ),
        compiler_params=pltpu.CompilerParams(
            dimension_semantics=("parallel", "parallel"),
            vmem_limit_bytes=64 * 1024 * 1024,
        ),
    )(x_p, embedding, emb_T)

    return q[:, :, :T] if T_pad != T else q


def _svq_reference(x, embedding):
    B, N, T = x.shape
    D = embedding.shape[1]
    x2d = jnp.transpose(x, (0, 2, 1)).reshape(B * T, D)
    eu = 2.0 - 2.0 * x2d @ embedding.T
    idx = jnp.argmin(eu, axis=-1)
    q = embedding[idx]
    return jnp.transpose(q.reshape(B, T, N), (0, 2, 1))


if __name__ == "__main__":
    key = jax.random.PRNGKey(0)
    num_code, code_dim = 64, 32
    B, T = 2, 8
    eps = jnp.finfo(jnp.float32).eps

    k_emb, k_x = jax.random.split(key)
    # embedding ~ N(0,1), then L2-normalized rows (as in SVQ.__init__).
    emb = jax.random.normal(k_emb, (num_code, code_dim), dtype=jnp.float32)
    emb = emb / jnp.sqrt(jnp.sum(emb * emb, axis=-1, keepdims=True) + eps)

    x = jax.random.normal(k_x, (B, code_dim, T), dtype=jnp.float32)

    q = svq_forward(x, emb)
    q = jax.block_until_ready(q)

    q_ref = _svq_reference(x, emb)
    assert q.shape == (B, code_dim, T)
    assert jnp.allclose(q, q_ref, atol=1e-5), "mismatch vs reference"

    print("KERNEL_OK")
</pallas_src>

<mosaic_0001>
module attributes {stable_mosaic.version = 11 : i64} {
  func.func @_svq_kernel(%arg0: i32, %arg1: i32, %arg2: memref<1x32x128xf32, #tpu.memory_space<vmem>>, %arg3: memref<64x32xf32, #tpu.memory_space<vmem>>, %arg4: memref<32x64xf32, #tpu.memory_space<vmem>>, %arg5: memref<1x32x128xf32, #tpu.memory_space<vmem>>) attributes {dimension_semantics = [#tpu.dimension_semantics<parallel>, #tpu.dimension_semantics<parallel>], iteration_bounds = array<i64: 2, 1>, scalar_prefetch = 0 : i64, scratch_operands = 0 : i64, tpu.core_type = #tpu.core_type<tc>, window_params = [{transform_indices = @transform_0, window_bounds = array<i64: 1, 32, 128>}, {pipeline_mode = #tpu.pipeline_mode<synchronous>, transform_indices = @transform_1, window_bounds = array<i64: 64, 32>}, {pipeline_mode = #tpu.pipeline_mode<synchronous>, transform_indices = @transform_2, window_bounds = array<i64: 32, 64>}, {transform_indices = @transform_3, window_bounds = array<i64: 1, 32, 128>}]} {
    %c0 = arith.constant 0 : index
    %c0_0 = arith.constant 0 : index
    %c0_1 = arith.constant 0 : index
    %0 = vector.load %arg2[%c0, %c0_0, %c0_1] : memref<1x32x128xf32, #tpu.memory_space<vmem>>, vector<1x32x128xf32>
    %1 = vector.shape_cast %0 : vector<1x32x128xf32> to vector<32x128xf32>
    %c0_2 = arith.constant 0 : index
    %c0_3 = arith.constant 0 : index
    %2 = vector.load %arg3[%c0_2, %c0_3] : memref<64x32xf32, #tpu.memory_space<vmem>>, vector<64x32xf32>
    %c0_4 = arith.constant 0 : index
    %c0_5 = arith.constant 0 : index
    %3 = vector.load %arg4[%c0_4, %c0_5] : memref<32x64xf32, #tpu.memory_space<vmem>>, vector<32x64xf32>
    %cst = arith.constant dense<0.000000e+00> : vector<64x128xf32>
    %4 = tpu.matmul %2, %1, %cst {dimension_numbers = #tpu.dot_dimension_numbers<[1], [0], [0], [1], [0, 0, 1, 1], [], []>} : vector<64x32xf32>, vector<32x128xf32>, vector<64x128xf32> -> vector<64x128xf32>
    %cst_6 = arith.constant dense<0xFF800000> : vector<128xf32>
    %5 = vector.multi_reduction <maximumf>, %4, %cst_6 [0] : vector<64x128xf32> to vector<128xf32>
    %6 = vector.shape_cast %5 : vector<128xf32> to vector<1x128xf32>
    %7 = tpu.iota {dimensions = array<i32: 0>} : vector<64x128xi32>
    %8 = vector.broadcast %6 : vector<1x128xf32> to vector<64x128xf32>
    %9 = arith.cmpf oeq, %4, %8 : vector<64x128xf32>
    %c64_i32 = arith.constant 64 : i32
    %10 = vector.broadcast %c64_i32 : i32 to vector<64x128xi32>
    %11 = arith.select %9, %7, %10 : vector<64x128xi1>, vector<64x128xi32>
    %cst_7 = arith.constant dense<2147483647> : vector<128xi32>
    %12 = vector.multi_reduction <minsi>, %11, %cst_7 [0] : vector<64x128xi32> to vector<128xi32>
    %13 = vector.shape_cast %12 : vector<128xi32> to vector<1x128xi32>
    %14 = vector.broadcast %13 : vector<1x128xi32> to vector<64x128xi32>
    %15 = arith.cmpi eq, %7, %14 : vector<64x128xi32>
    %16 = arith.extui %15 : vector<64x128xi1> to vector<64x128xi32>
    %17 = arith.sitofp %16 : vector<64x128xi32> to vector<64x128xf32>
    %cst_8 = arith.constant dense<0.000000e+00> : vector<32x128xf32>
    %18 = tpu.matmul %3, %17, %cst_8 {dimension_numbers = #tpu.dot_dimension_numbers<[1], [0], [0], [1], [0, 0, 1, 1], [], []>} : vector<32x64xf32>, vector<64x128xf32>, vector<32x128xf32> -> vector<32x128xf32>
    %c0_9 = arith.constant 0 : index
    %c0_10 = arith.constant 0 : index
    %c0_11 = arith.constant 0 : index
    %19 = vector.load %arg5[%c0_9, %c0_10, %c0_11] : memref<1x32x128xf32, #tpu.memory_space<vmem>>, vector<1x32x128xf32>
    %20 = vector.shape_cast %19 : vector<1x32x128xf32> to vector<32x128xf32>
    %21 = vector.shape_cast %18 : vector<32x128xf32> to vector<1x32x128xf32>
    tpu.vector_store %arg5[%c0_9, %c0_10, %c0_11], %21 {strides = array<i32>} : memref<1x32x128xf32, #tpu.memory_space<vmem>>, vector<1x32x128xf32>,
    return
  }
  func.func @transform_0(%arg0: i32, %arg1: i32) -> (i32, i32, i32) {
    %c0_i32 = arith.constant 0 : i32
    %c0_i32_0 = arith.constant 0 : i32
    return %arg0, %c0_i32, %arg1 : i32, i32, i32
  }
  func.func @transform_1(%arg0: i32, %arg1: i32) -> (i32, i32) {
    %c0_i32 = arith.constant 0 : i32
    %c0_i32_0 = arith.constant 0 : i32
    %c0_i32_1 = arith.constant 0 : i32
    return %c0_i32, %c0_i32_0 : i32, i32
  }
  func.func @transform_2(%arg0: i32, %arg1: i32) -> (i32, i32) {
    %c0_i32 = arith.constant 0 : i32
    %c0_i32_0 = arith.constant 0 : i32
    %c0_i32_1 = arith.constant 0 : i32
    return %c0_i32, %c0_i32_0 : i32, i32
  }
  func.func @transform_3(%arg0: i32, %arg1: i32) -> (i32, i32, i32) {
    %c0_i32 = arith.constant 0 : i32
    %c0_i32_0 = arith.constant 0 : i32
    return %arg0, %c0_i32, %arg1 : i32, i32, i32
  }
}

</mosaic_0001>

<bundles_post_ra>
// kernel: tpu_custom_call.1
= control target key start
LH: loop header
LB: loop body
LE: loop exit
PB: predicated region body
PF: predicated region fallthrough
CT: control target
= control target key end

     0   :  { %8 = vsyncpa [#allocation3], 0  ;;  %s878_s0 = inlined_call_operand.vmem [shape: f32[2,32,128], index: 0, kind: input, shape index: {}]   ;;  %s879_s1 = inlined_call_operand.vmem [shape: f32[64,32], index: 1, kind: input, shape index: {}]   ;;  %s880_s2 = inlined_call_operand.vmem [shape: f32[32,64], index: 2, kind: input, shape index: {}]   ;;  %s881_s3 = inlined_call_operand.hbm [shape: f32[2,32,128], index: 3, kind: output, shape index: {}]  }
   0x1   :  { %10 = vsyncpa [#allocation3 + $0x1], 0  ;;  %s718_s12 = smov 0   ;;  %s720_s13 = smov 0  }
   0x2   :  { %s722_s14 = smov 0   ;;  %s724_s15 = smov 0  }
   0x3   :  { %s726_s16 = smov 0   ;;  %s728_s17 = smov 0  }
   0x4 LB: > { %s502_s18 = sadd.s32 4294967295, %s693_s17   ;;  %s503_s19 = sadd.s32 4294967294, %s693_s17   ;;  %s693_s17 = sphi %s728_s17, %s16_s17   ;;  %s689_s16 = sphi %s726_s16, %s888_s16   ;;  %s685_s15 = sphi %s724_s15, %s887_s15   ;;  %s681_s14 = sphi %s722_s14, %s886_s14   ;;  %s677_s13 = sphi %s720_s13, %s885_s13   ;;  %s673_s12 = sphi %s718_s12, %s884_s12  }
   0x5   : > { %s28_s20 = sadd.s32 1, %s689_s16  ;;  %s107_s21 = sadd.s32 1, %s681_s14 }
   0x6   : > { %p30_p0 = scmp.ge.s32.totalorder %s28_s20, 2  ;;  %p117_p1 = scmp.ne.s32.totalorder %s681_s14, %s677_s13 }
   0x7   : > { %p118_p2 = scmp.eq.s32.totalorder %s502_s18, 1  ;;  %p123_p3 = scmp.ne.s32.totalorder %s677_s13, %s673_s12 }
   0x8   : > { %s890_s20 = smov (%p30_p0, %s28_s20), 0  ;;  %p124_p5 = scmp.eq.s32.totalorder %s503_s19, 1 }
   0x9   : > { %p758_p4 = por %p118_p2, %p117_p1  ;;  %s102_s23 = ssub.s32 %s689_s16, %s890_s20 }
   0xa   : > { %p506_p6 = scmp.ge.s32.totalorder %s693_s17, 1  ;;  %p105_p7 = scmp.eq.s32.totalorder %s102_s23, 0 }
   0xb   : > { %p765_p8 = por %p124_p5, %p123_p3  ;;  %p159_p9 = scmp.lt.s32.totalorder %s693_s17, 3 }
   0xc   : > { %s771_s25 = scalar_select %p105_p7, %s681_s14, %s107_s21  }
   0xd   : > { %p160_p10 = pnand %p506_p6, %p159_p9 }
   0xe   : > { %p186_p11 = scmp.lt.s32.totalorder (!%p160_p10), %s685_s15, 1  ;;  %s183_s11 = sand.u32 (!%p160_p10), 1, %s677_s13  }
   0xf   : > { %163 = sbr.rel (%p160_p10) target bundleno = 404 (0x194), region = 32  ;;  %s507_s18 = sshll.u32 (!%p160_p10), %s183_s11, 5 }
  0x10   : > { %s185_s19 = scalar_lea.vmem (!%p160_p10), [#allocation2], %s507_s18  ;;  %s544_s21 = sshll.u32 (!%p160_p10), %s685_s15, 5 }
  0x11   : > { %s421_s28 = sshll.u32 (!%p160_p10), %s185_s19, 4  ;;  %s635_s7 = scalar_lea.hbm (!%p160_p10), %s881_s3, 64  ;;  %s422_s28 = int_to_ptr.vmem [resolvable:$true] %s421_s28 }
  0x14   : > { %s187_s26 = scalar_select %p186_p11, %s685_s15, 1  ;;  %v201_v4 = vld [vmem:[%s879_s1 + $0x18] sm:$0xff]  ;;  %vm210_vm0 = vcmask 261120   ;;  %v198_v5 = vld [vmem:[%s879_s1] sm:$0xff]  ;;  %v199_v7 = vld [vmem:[%s879_s1 + $0x8] sm:$0xff]  ;;  %v289_v29 = vlaneseq  ;;  %v695_v63 = vmov 1.0  }
  0x15   : > { %v202_v6 = vld [vmem:[%s879_s1 + $0x20] sm:$0xff]  ;;  %v203_v8 = vld [vmem:[%s879_s1 + $0x28] sm:$0xff]  ;;  %v200_v9 = vld [vmem:[%s879_s1 + $0x10] sm:$0xff] }
  0x16   : > { %s543_s27 = sshll.u32 %s187_s26, 5  ;;  %v204_v10 = vld [vmem:[%s879_s1 + $0x30] sm:$0xff]  ;;  %v205_v11 = vld [vmem:[%s879_s1 + $0x38] sm:$0xff]  ;;  %v810_v32 = vshrl.u32 %v289_v29, 7 }
  0x17   : > { %s193_s30 = scalar_lea.vmem %s878_s0, %s543_s27  ;;  %s420_s27 = scalar_lea.hbm %s881_s3, %s544_s21 }
  0x18   : > { %v197_v0 = vld [vmem:[%s193_s30 + $0x18] sm:$0xff]  ;;  %v196_v1 = vld [vmem:[%s193_s30 + $0x10] sm:$0xff]  ;;  %v195_v2 = vld [vmem:[%s193_s30 + $0x8] sm:$0xff]  ;;  %v813_v35 = vadd.s32 8, %v810_v32  ;;  %v816_v36 = vadd.s32 16, %v810_v32  ;;  %v293_v37 = vadd.s32 24, %v810_v32 }
  0x19   : > { %545 = vmatpush.msra.mxu2 %v197_v0  ;;  %247 = vmatpush.msra.mxu0 %v197_v0  ;;  %v194_v3 = vld [vmem:[%s193_s30] sm:$0xff]  ;;  %v294_v38 = vadd.s32 32, %v810_v32  ;;  %v295_v39 = vadd.s32 40, %v810_v32  ;;  %v296_v40 = vadd.s32 48, %v810_v32  ;;  %v297_v41 = vadd.s32 56, %v810_v32  ;;  %v207_v0 = vld [vmem:[%s880_s2 + $0x8] sm:$0xff] }
  0x1a   : > { %s423_s29 = sshll.u32 %s420_s27, 4  ;;  %s408_s30 = scalar_lea.sflag [#allocation3], %s183_s11  ;;  %s424_s29 = int_to_ptr.hbm [resolvable:$true] %s423_s29 }
  0x1b   : > { %546 = vmatpush.msra.mxu2 %v196_v1  ;;  %248 = vmatpush.msra.mxu0 %v196_v1  ;;  %v206_v1 = vld [vmem:[%s880_s2] sm:$0xff]  ;;  %s629_s4 = sshra.s32 %s424_s29, 4  ;;  %s630_s4 = int_to_ptr.hbm [resolvable:$true] %s629_s4 }
  0x1c   : > { %s631_s5 = scalar_lea.hbm %s630_s4, 32  ;;  %p636_p1 = scmp.lt.s32.totalorder %s630_s4, %s881_s3 }
  0x1d   : > { %547 = vmatpush.msra.mxu2 %v195_v2  ;;  %249 = vmatpush.msra.mxu0 %v195_v2  ;;  %v208_v2 = vld [vmem:[%s880_s2 + $0x10] sm:$0xff]  ;;  %p632_p12 = scmp.ne.s32.totalorder %s630_s4, %s631_s5  ;;  %p637_p2 = scmp.lt.s32.totalorder %s635_s7, %s631_s5 }
  0x1f   : > { %548 = vmatpush.msra.mxu2 %v194_v3  ;;  %250 = vmatpush.msra.mxu0 %v194_v3  ;;  %v209_v3 = vld [vmem:[%s880_s2 + $0x18] sm:$0xff]  ;;  %p633_p13 = pnand %p632_p12, %p758_p4  ;;  %p638_p3 = por %p637_p2, %p636_p1 }
  0x20   : > { %513 = vmatmul.msk.f32.vlgmr.msra.gmra.mxu2 %vm210_vm0, %v201_v4  ;;  %510 = vmatmul.msk.f32.vlgmr.msra.gmra.mxu0 %vm210_vm0, %v198_v5 }
  0x21   : > { %p634_p0 = pneg %p633_p13 }
  0x23   : > { %p639_p5 = pnand %p638_p3, %p634_p0 }
  0x28   : > { %514 = vmatmul.msk.f32.gmra.mxu2 %vm210_vm0, %v202_v6  ;;  %511 = vmatmul.msk.f32.gmra.mxu0 %vm210_vm0, %v199_v7 }
  0x30   : > { %515 = vmatmul.msk.f32.gmra.mxu2 %vm210_vm0, %v203_v8  ;;  %512 = vmatmul.msk.f32.gmra.mxu0 %vm210_vm0, %v200_v9 }
  0x38   : > { %516 = vmatmul.msk.f32.gmra.mxu2 %vm210_vm0, %v204_v10 }
  0x40   : > { %517 = vmatmul.msk.f32.gmra.mxu2 %vm210_vm0, %v205_v11 }
  0x9d   : > { %v252_v14 = vpop.f32.mrf.mxu0 }
  0xa3   : > { %v261_v12 = vpop.f32.mrf.mxu2 }
  0xa5   : > { %v255_v16 = vpop.f32.mrf.mxu0 }
  0xab   : > { %v264_v13 = vpop.f32.mrf.mxu2 }
  0xac   : > { %v276_v21 = vmax.f32 %v252_v14, %v264_v13 }
  0xad   : > { %v258_v18 = vpop.f32.mrf.mxu0 }
  0xb3   : > { %v267_v15 = vpop.f32.mrf.mxu2 }
  0xb4   : > { %v277_v19 = vmax.f32 %v255_v16, %v267_v15 }
  0xb6   : > { %v280_v24 = vmax.f32 %v276_v21, %v277_v19 }
  0xbb   : > { %v270_v17 = vpop.f32.mrf.mxu2 }
  0xbc   : > { %v278_v22 = vmax.f32 %v258_v18, %v270_v17 }
  0xc3   : > { %v273_v20 = vpop.f32.mrf.mxu2 }
  0xc4   : > { %v279_v23 = vmax.f32 %v261_v12, %v273_v20 }
  0xc6   : > { %v281_v25 = vmax.f32 %v278_v22, %v279_v23 }
  0xc8   : > { %v282_v26 = vmax.f32 %v280_v24, %v281_v25 }
  0xca   : > { %v283_v27 = vrot.slane %v282_v26, 4 }
  0xcc   : > { %v284_v28 = vmax.f32 %v282_v26, %v283_v27 }
  0xce   : > { %v285_v30 = vrot.slane %v284_v28, 2 }
  0xd0   : > { %v286_v31 = vmax.f32 %v284_v28, %v285_v30 }
  0xd2   : > { %v287_v33 = vrot.slane %v286_v31, 1 }
  0xd4   : > { %v288_v34 = vmax.f32 %v286_v31, %v287_v33 }
  0xd6   : > { %vm298_vm1 = vcmp.eq.f32.partialorder %v252_v14, %v288_v34  ;;  %vm299_vm2 = vcmp.eq.f32.partialorder %v255_v16, %v288_v34  ;;  %vm300_vm3 = vcmp.eq.f32.partialorder %v258_v18, %v288_v34  ;;  %vm301_vm4 = vcmp.eq.f32.partialorder %v261_v12, %v288_v34 }
  0xd7   : > { %vm302_vm5 = vcmp.eq.f32.partialorder %v264_v13, %v288_v34  ;;  %vm303_vm6 = vcmp.eq.f32.partialorder %v267_v15, %v288_v34  ;;  %vm304_vm7 = vcmp.eq.f32.partialorder %v270_v17, %v288_v34  ;;  %vm305_vm8 = vcmp.eq.f32.partialorder %v273_v20, %v288_v34 }
  0xd8   : > { %v306_v42 = vsel %vm298_vm1, %v810_v32, 64  ;;  %v307_v43 = vsel %vm299_vm2, %v813_v35, 64  ;;  %v308_v44 = vsel %vm300_vm3, %v816_v36, 64  ;;  %v309_v45 = vsel %vm301_vm4, %v293_v37, 64 }
  0xd9   : > { %v310_v46 = vsel %vm302_vm5, %v294_v38, 64  ;;  %v311_v47 = vsel %vm303_vm6, %v295_v39, 64  ;;  %v312_v48 = vsel %vm304_vm7, %v296_v40, 64  ;;  %v313_v49 = vsel %vm305_vm8, %v297_v41, 64 }
  0xda   : > { %vm314_vm9 = vcmp.lt.s32.totalorder %v306_v42, %v310_v46  ;;  %vm316_vm10 = vcmp.lt.s32.totalorder %v307_v43, %v311_v47  ;;  %vm318_vm11 = vcmp.lt.s32.totalorder %v308_v44, %v312_v48  ;;  %vm320_vm12 = vcmp.lt.s32.totalorder %v309_v45, %v313_v49 }
  0xdb   : > { %v315_v50 = vsel %vm314_vm9, %v306_v42, %v310_v46  ;;  %v317_v51 = vsel %vm316_vm10, %v307_v43, %v311_v47  ;;  %v319_v52 = vsel %vm318_vm11, %v308_v44, %v312_v48  ;;  %v321_v53 = vsel %vm320_vm12, %v309_v45, %v313_v49 }
  0xdc   : > { %vm322_vm13 = vcmp.lt.s32.totalorder %v315_v50, %v317_v51  ;;  %vm324_vm14 = vcmp.lt.s32.totalorder %v319_v52, %v321_v53  ;;  %vm361_vm10 = vcmask 523264  }
  0xdd   : > { %v323_v54 = vsel %vm322_vm13, %v315_v50, %v317_v51  ;;  %v325_v55 = vsel %vm324_vm14, %v319_v52, %v321_v53 }
  0xde   : > { %vm326_vm15 = vcmp.lt.s32.totalorder %v323_v54, %v325_v55 }
  0xdf   : > { %v327_v56 = vsel %vm326_vm15, %v323_v54, %v325_v55 }
  0xe0   : > { %v328_v57 = vrot.slane %v327_v56, 4 }
  0xe2   : > { %vm329_vm0 = vcmp.lt.s32.totalorder %v327_v56, %v328_v57 }
  0xe3   : > { %v330_v58 = vsel %vm329_vm0, %v327_v56, %v328_v57 }
  0xe4   : > { %v331_v59 = vrot.slane %v330_v58, 2 }
  0xe6   : > { %vm332_vm1 = vcmp.lt.s32.totalorder %v330_v58, %v331_v59 }
  0xe7   : > { %v333_v60 = vsel %vm332_vm1, %v330_v58, %v331_v59 }
  0xe8   : > { %v334_v61 = vrot.slane %v333_v60, 1 }
  0xea   : > { %vm335_vm2 = vcmp.lt.s32.totalorder %v333_v60, %v334_v61 }
  0xeb   : > { %v336_v62 = vsel %vm335_vm2, %v333_v60, %v334_v61 }
  0xec   : > { %vm344_vm3 = vcmp.eq.s32.totalorder %v297_v41, %v336_v62  ;;  %vm343_vm4 = vcmp.eq.s32.totalorder %v296_v40, %v336_v62  ;;  %vm342_vm5 = vcmp.eq.s32.totalorder %v295_v39, %v336_v62  ;;  %vm341_vm6 = vcmp.eq.s32.totalorder %v294_v38, %v336_v62 }
  0xed   : > { %526 = vmatpush.msk.msra.mxu1 %vm344_vm3, %v695_v63  ;;  %549 = vmatpush.msk.msra.mxu3 %vm344_vm3, %v695_v63  ;;  %vm340_vm7 = vcmp.eq.s32.totalorder %v293_v37, %v336_v62  ;;  %vm339_vm8 = vcmp.eq.s32.totalorder %v816_v36, %v336_v62  ;;  %vm338_vm9 = vcmp.eq.s32.totalorder %v813_v35, %v336_v62 }
  0xee   : > { %vm337_vm11 = vcmp.eq.s32.totalorder %v810_v32, %v336_v62 }
  0xef   : > { %527 = vmatpush.msk.msra.mxu1 %vm343_vm4, %v695_v63  ;;  %550 = vmatpush.msk.msra.mxu3 %vm343_vm4, %v695_v63 }
  0xf1   : > { %528 = vmatpush.msk.msra.mxu1 %vm342_vm5, %v695_v63  ;;  %551 = vmatpush.msk.msra.mxu3 %vm342_vm5, %v695_v63 }
  0xf3   : > { %529 = vmatpush.msk.msra.mxu1 %vm341_vm6, %v695_v63  ;;  %552 = vmatpush.msk.msra.mxu3 %vm341_vm6, %v695_v63 }
  0xf5   : > { %530 = vmatpush.msk.msra.mxu1 %vm340_vm7, %v695_v63  ;;  %553 = vmatpush.msk.msra.mxu3 %vm340_vm7, %v695_v63 }
  0xf7   : > { %531 = vmatpush.msk.msra.mxu1 %vm339_vm8, %v695_v63  ;;  %554 = vmatpush.msk.msra.mxu3 %vm339_vm8, %v695_v63 }
  0xf9   : > { %532 = vmatpush.msk.msra.mxu1 %vm338_vm9, %v695_v63  ;;  %555 = vmatpush.msk.msra.mxu3 %vm338_vm9, %v695_v63 }
  0xfb   : > { %533 = vmatpush.msk.msra.mxu1 %vm337_vm11, %v695_v63  ;;  %556 = vmatpush.msk.msra.mxu3 %vm337_vm11, %v695_v63 }
  0xfc   : > { %535 = vmatmul.msk.f32.vlgmr.msra.gmra.mxu3 %vm361_vm10, %v207_v0  ;;  %534 = vmatmul.msk.f32.vlgmr.msra.gmra.mxu1 %vm361_vm10, %v206_v1 }
 0x104   : > { %536 = vmatmul.msk.f32.gmra.mxu3 %vm361_vm10, %v208_v2 }
 0x10c   : > { %537 = vmatmul.msk.f32.gmra.mxu3 %vm361_vm10, %v209_v3 }
 0x179   : > { %v391_v4 = vpop.f32.mrf.mxu1 }
 0x17a   : > { %403 = vst [vmem:[%s185_s19] sm:$0xff] %v391_v4 }
 0x17f   : > { %v394_v5 = vpop.f32.mrf.mxu3 }
 0x180   : > { %404 = vst [vmem:[%s185_s19 + $0x8] sm:$0xff] %v394_v5 }
 0x187   : > { %v397_v6 = vpop.f32.mrf.mxu3 }
 0x188   : > { %405 = vst [vmem:[%s185_s19 + $0x10] sm:$0xff] %v397_v6 }
 0x18f   : > { %v400_v7 = vpop.f32.mrf.mxu3 }
 0x190   : > { %406 = vst [vmem:[%s185_s19 + $0x18] sm:$0xff] %v400_v7 }
 0x191   : > { %642 = shalt.err (!%p639_p5)
}
 0x192   : > { %s696_s10 = smov 128   ;;  %s697_s11 = smov 8  }
 0x193   : > { %557 = dma.vmem_to_hbm [thread:$0]  (%p758_p4), %s422_s28, 512, %s424_s29, %s408_s30, %s696_s10, %s696_s10, %s697_s11  }
 0x194 PF: > { %p563_p6 = scmp.ge.s32.totalorder %s693_s17, 2  ;;  %s438_s18 = sand.u32 1, %s673_s12  }
 0x195   : > { %s439_s19 = scalar_lea.sflag [#allocation3], %s438_s18 }
 0x196   : > { %p560_p7 = pnand %p563_p6, %p765_p8 }
 0x198   : > { %p561_p9 = pneg %p560_p7 }
 0x19a   : > { %668 = dma.done.wait (%p561_p9), %s439_s19, 512  }
 0x19b   : > { %670 = vsyncadd (%p561_p9), %s439_s19, 4294966784  ;;  %s16_s17 = sadd.s32 1, %s693_s17   ;;  %s884_s12 = smov %s677_s13 }
 0x19c   : > { %p13_p10 = scmp.ge.s32.totalorder %s16_s17, 4   ;;  %s885_s13 = smov %s681_s14 }
 0x19d   : > { %s886_s14 = smov %s771_s25  ;;  %s887_s15 = smov %s689_s16 }
 0x19e   : > { %s888_s16 = smov %s890_s20  ;;  %15 = sbr.rel (!%p13_p10) target bundleno = 4 (0x4), region = 67 }
 0x1a3   :  { %445 = vsyncpa [#allocation3], 1 }
 0x1a4   :  { %447 = vsyncpa [#allocation3 + $0x1], 1 }

</bundles_post_ra>
